<compile_context>
chip_gen: v6e
topology: v6e:2x2x1
jax: 0.10.0
libtpu: 0.0.40
codegen_flags: <defaults>
</compile_context>

<pallas_src>
import math

import jax
import jax.numpy as jnp
from jax.experimental import pallas as pl
from jax.experimental.pallas import tpu as pltpu

AUGMENT_DIM = 2
INPUT_DIM = 2
THIS_INPUT_DIM = AUGMENT_DIM + INPUT_DIM   # D = 4
HIDDEN_DIM = 32                            # H
NUM_LAYERS = 2                             # Linear(D,H),Tanh,Linear(H,H),Tanh,Linear(H,D)

_LANE = 128
_MAX_TILE_N = 1024                         # lane-tile cap (review: 512-2048 range)


def _aug_ode_mlp_kernel(y_ref, *refs):
    """Evaluate AugmentedODEFunc.net on one (D, TILE_N) column tile.

    Feature-major layout: batch rides the lanes.
      refs = (w0, b0, w1, b1, ..., wL, bL, out_ref)
      weights in PyTorch (out, in) layout, biases as (out, 1) columns.
    """
    out_ref = refs[-1]
    wb = refs[:-1]
    n_lin = len(wb) // 2

    h = y_ref[...]                                    # (D, TN), lane-dense batch axis
    for l in range(n_lin):
        w = wb[2 * l][...]                            # (out, in)
        b = wb[2 * l + 1][...]                        # (out, 1) -> broadcasts along lanes
        # MXU matmul; HIGHEST precision keeps exact f32 agreement with the
        # reference (free here: the kernel is overhead/bandwidth bound).
        h = jnp.dot(w, h, preferred_element_type=jnp.float32,
                    precision=jax.lax.Precision.HIGHEST) + b
        if l < n_lin - 1:
            h = jnp.tanh(h)                           # EUP
    out_ref[...] = h.astype(out_ref.dtype)            # (D, TN) lane-dense unmasked store


def _round_up(x, m):
    return ((x + m - 1) // m) * m


def augmented_ode_func_forward(t, y, params):
    """Pallas forward of AugmentedODEFunc.forward(t, y) == net(y).

    y: (..., D) float32.  t is accepted (odeint interface) but unused, exactly
    like the PyTorch module.  params: flat list [w0, b0, w1, b1, ...] with
    weights in (out, in) layout and biases shaped (out, 1).
    """
    del t  # the module ignores t

    orig_shape = y.shape
    D = orig_shape[-1]
    # Feature-major: batch on lanes.  One wrapper-side transpose (layout
    # plumbing); keeping the ODE state in (D, N) across a solver would
    # amortize even this away.
    yT = y.reshape(-1, D).astype(jnp.float32).T        # (D, N)
    n = yT.shape[1]

    # Big lane tiles to amortize the per-grid-step overhead.  Whole batch in
    # one tile when it is modest; otherwise cap the tile so the grid keeps at
    # least 2 steps (lets the "parallel" axis use both v7x TensorCores).
    if n <= 2 * _LANE:
        tile_n = max(_LANE, _round_up(n, _LANE))
    else:
        tile_n = min(_MAX_TILE_N, _round_up(pl.cdiv(n, 2), _LANE))
    grid = (pl.cdiv(n, tile_n),)   # no wrapper-side padding: Pallas masks the edge block

    in_specs = [pl.BlockSpec((D, tile_n), lambda i: (0, i))]
    for p in params:
        # Whole-array blocks, same block every grid step -> weights stay
        # VMEM-resident (re-DMA skipped); total < 10 KiB on every generation.
        in_specs.append(pl.BlockSpec(p.shape, lambda i: (0, 0)))

    outT = pl.pallas_call(
        _aug_ode_mlp_kernel,
        out_shape=jax.ShapeDtypeStruct((D, n), jnp.float32),
        grid=grid,
        in_specs=in_specs,
        out_specs=pl.BlockSpec((D, tile_n), lambda i: (0, i)),
        compiler_params=pltpu.CompilerParams(
            dimension_semantics=("parallel",)),
    )(yT, *params)

    return outT.T.reshape(orig_shape)


def init_params(key, in_dim, hidden_dim, num_layers):
    """PyTorch-style Linear init (uniform +/- 1/sqrt(fan_in)), (out, in) layout."""
    dims = [in_dim] + [hidden_dim] * num_layers + [in_dim]
    keys = jax.random.split(key, 2 * (len(dims) - 1))
    params = []
    for l in range(len(dims) - 1):
        fan_in, fan_out = dims[l], dims[l + 1]
        bound = 1.0 / math.sqrt(float(fan_in))
        w = jax.random.uniform(keys[2 * l], (fan_out, fan_in), jnp.float32, -bound, bound)
        b = jax.random.uniform(keys[2 * l + 1], (fan_out, 1), jnp.float32, -bound, bound)
        params += [w, b]
    return params


def _ref_forward(t, y, params):
    """Pure-JAX reference of AugmentedODEFunc.forward (t unused)."""
    del t
    h = y.astype(jnp.float32)
    n_lin = len(params) // 2
    for l in range(n_lin):
        w, b = params[2 * l], params[2 * l + 1]        # (out, in), (out, 1)
        h = jnp.dot(h, w.T, precision="highest") + b.reshape(1, -1)
        if l < n_lin - 1:
            h = jnp.tanh(h)
    return h


if __name__ == "__main__":
    key = jax.random.PRNGKey(0)
    k_y, k_p = jax.random.split(key)

    B, D, H = 256, THIS_INPUT_DIM, HIDDEN_DIM
    y = jax.random.normal(k_y, (B, D), dtype=jnp.float32)
    t = jnp.float32(0.0)                       # unused by the module's forward

    params = init_params(k_p, D, H, NUM_LAYERS)

    out = augmented_ode_func_forward(t, y, params)
    jax.block_until_ready(out)

    ref = _ref_forward(t, y, params)
    assert out.shape == y.shape, f"shape mismatch: {out.shape} vs {y.shape}"
    assert jnp.allclose(out, ref, atol=1e-5, rtol=1e-5), "mismatch vs reference"

    print("KERNEL_OK")
</pallas_src>

<mosaic_0001>
module attributes {stable_mosaic.version = 11 : i64} {
  func.func @_aug_ode_mlp_kernel(%arg0: i32, %arg1: memref<4x256xf32, #tpu.memory_space<vmem>>, %arg2: memref<32x4xf32, #tpu.memory_space<vmem>>, %arg3: memref<32x1xf32, #tpu.memory_space<vmem>>, %arg4: memref<32x32xf32, #tpu.memory_space<vmem>>, %arg5: memref<32x1xf32, #tpu.memory_space<vmem>>, %arg6: memref<4x32xf32, #tpu.memory_space<vmem>>, %arg7: memref<4x1xf32, #tpu.memory_space<vmem>>, %arg8: memref<4x256xf32, #tpu.memory_space<vmem>>) attributes {dimension_semantics = [#tpu.dimension_semantics<parallel>], iteration_bounds = array<i64: 1>, scalar_prefetch = 0 : i64, scratch_operands = 0 : i64, tpu.core_type = #tpu.core_type<tc>, window_params = [{transform_indices = @transform_0, window_bounds = array<i64: 4, 256>}, {pipeline_mode = #tpu.pipeline_mode<synchronous>, transform_indices = @transform_1, window_bounds = array<i64: 32, 4>}, {pipeline_mode = #tpu.pipeline_mode<synchronous>, transform_indices = @transform_2, window_bounds = array<i64: 32, 1>}, {pipeline_mode = #tpu.pipeline_mode<synchronous>, transform_indices = @transform_3, window_bounds = array<i64: 32, 32>}, {pipeline_mode = #tpu.pipeline_mode<synchronous>, transform_indices = @transform_4, window_bounds = array<i64: 32, 1>}, {pipeline_mode = #tpu.pipeline_mode<synchronous>, transform_indices = @transform_5, window_bounds = array<i64: 4, 32>}, {pipeline_mode = #tpu.pipeline_mode<synchronous>, transform_indices = @transform_6, window_bounds = array<i64: 4, 1>}, {transform_indices = @transform_7, window_bounds = array<i64: 4, 256>}]} {
    %c0 = arith.constant 0 : index
    %c0_0 = arith.constant 0 : index
    %0 = vector.load %arg1[%c0, %c0_0] : memref<4x256xf32, #tpu.memory_space<vmem>>, vector<4x256xf32>
    %c0_1 = arith.constant 0 : index
    %c0_2 = arith.constant 0 : index
    %1 = vector.load %arg2[%c0_1, %c0_2] : memref<32x4xf32, #tpu.memory_space<vmem>>, vector<32x4xf32>
    %c0_3 = arith.constant 0 : index
    %c0_4 = arith.constant 0 : index
    %2 = vector.load %arg3[%c0_3, %c0_4] : memref<32x1xf32, #tpu.memory_space<vmem>>, vector<32x1xf32>
    %cst = arith.constant dense<0.000000e+00> : vector<32x256xf32>
    %3 = tpu.matmul %1, %0, %cst {dimension_numbers = #tpu.dot_dimension_numbers<[1], [0], [0], [1], [0, 0, 1, 1], [], []>, precision = #tpu.contract_precision<fp32>} : vector<32x4xf32>, vector<4x256xf32>, vector<32x256xf32> -> vector<32x256xf32>
    %4 = vector.broadcast %2 : vector<32x1xf32> to vector<32x256xf32>
    %5 = arith.addf %3, %4 : vector<32x256xf32>
    %6 = math.tanh %5 : vector<32x256xf32>
    %c0_5 = arith.constant 0 : index
    %c0_6 = arith.constant 0 : index
    %7 = vector.load %arg4[%c0_5, %c0_6] : memref<32x32xf32, #tpu.memory_space<vmem>>, vector<32x32xf32>
    %c0_7 = arith.constant 0 : index
    %c0_8 = arith.constant 0 : index
    %8 = vector.load %arg5[%c0_7, %c0_8] : memref<32x1xf32, #tpu.memory_space<vmem>>, vector<32x1xf32>
    %cst_9 = arith.constant dense<0.000000e+00> : vector<32x256xf32>
    %9 = tpu.matmul %7, %6, %cst_9 {dimension_numbers = #tpu.dot_dimension_numbers<[1], [0], [0], [1], [0, 0, 1, 1], [], []>, precision = #tpu.contract_precision<fp32>} : vector<32x32xf32>, vector<32x256xf32>, vector<32x256xf32> -> vector<32x256xf32>
    %10 = vector.broadcast %8 : vector<32x1xf32> to vector<32x256xf32>
    %11 = arith.addf %9, %10 : vector<32x256xf32>
    %12 = math.tanh %11 : vector<32x256xf32>
    %c0_10 = arith.constant 0 : index
    %c0_11 = arith.constant 0 : index
    %13 = vector.load %arg6[%c0_10, %c0_11] : memref<4x32xf32, #tpu.memory_space<vmem>>, vector<4x32xf32>
    %c0_12 = arith.constant 0 : index
    %c0_13 = arith.constant 0 : index
    %14 = vector.load %arg7[%c0_12, %c0_13] : memref<4x1xf32, #tpu.memory_space<vmem>>, vector<4x1xf32>
    %cst_14 = arith.constant dense<0.000000e+00> : vector<4x256xf32>
    %15 = tpu.matmul %13, %12, %cst_14 {dimension_numbers = #tpu.dot_dimension_numbers<[1], [0], [0], [1], [0, 0, 1, 1], [], []>, precision = #tpu.contract_precision<fp32>} : vector<4x32xf32>, vector<32x256xf32>, vector<4x256xf32> -> vector<4x256xf32>
    %16 = vector.broadcast %14 : vector<4x1xf32> to vector<4x256xf32>
    %17 = arith.addf %15, %16 : vector<4x256xf32>
    %c0_15 = arith.constant 0 : index
    %c0_16 = arith.constant 0 : index
    %18 = vector.load %arg8[%c0_15, %c0_16] : memref<4x256xf32, #tpu.memory_space<vmem>>, vector<4x256xf32>
    tpu.vector_store %arg8[%c0_15, %c0_16], %17 {strides = array<i32>} : memref<4x256xf32, #tpu.memory_space<vmem>>, vector<4x256xf32>,
    return
  }
  func.func @transform_0(%arg0: i32) -> (i32, i32) {
    %c0_i32 = arith.constant 0 : i32
    %c0_i32_0 = arith.constant 0 : i32
    return %c0_i32, %arg0 : i32, i32
  }
  func.func @transform_1(%arg0: i32) -> (i32, i32) {
    %c0_i32 = arith.constant 0 : i32
    %c0_i32_0 = arith.constant 0 : i32
    %c0_i32_1 = arith.constant 0 : i32
    return %c0_i32, %c0_i32_0 : i32, i32
  }
  func.func @transform_2(%arg0: i32) -> (i32, i32) {
    %c0_i32 = arith.constant 0 : i32
    %c0_i32_0 = arith.constant 0 : i32
    %c0_i32_1 = arith.constant 0 : i32
    return %c0_i32, %c0_i32_0 : i32, i32
  }
  func.func @transform_3(%arg0: i32) -> (i32, i32) {
    %c0_i32 = arith.constant 0 : i32
    %c0_i32_0 = arith.constant 0 : i32
    %c0_i32_1 = arith.constant 0 : i32
    return %c0_i32, %c0_i32_0 : i32, i32
  }
  func.func @transform_4(%arg0: i32) -> (i32, i32) {
    %c0_i32 = arith.constant 0 : i32
    %c0_i32_0 = arith.constant 0 : i32
    %c0_i32_1 = arith.constant 0 : i32
    return %c0_i32, %c0_i32_0 : i32, i32
  }
  func.func @transform_5(%arg0: i32) -> (i32, i32) {
    %c0_i32 = arith.constant 0 : i32
    %c0_i32_0 = arith.constant 0 : i32
    %c0_i32_1 = arith.constant 0 : i32
    return %c0_i32, %c0_i32_0 : i32, i32
  }
  func.func @transform_6(%arg0: i32) -> (i32, i32) {
    %c0_i32 = arith.constant 0 : i32
    %c0_i32_0 = arith.constant 0 : i32
    %c0_i32_1 = arith.constant 0 : i32
    return %c0_i32, %c0_i32_0 : i32, i32
  }
  func.func @transform_7(%arg0: i32) -> (i32, i32) {
    %c0_i32 = arith.constant 0 : i32
    %c0_i32_0 = arith.constant 0 : i32
    return %c0_i32, %arg0 : i32, i32
  }
}

</mosaic_0001>

<bundles_post_ra>
// kernel: tpu_custom_call.1
= control target key start
LH: loop header
LB: loop body
LE: loop exit
PB: predicated region body
PF: predicated region fallthrough
CT: control target
= control target key end

     0   :  { %vm71_vm0 = vcmask 1043456   ;;  %vm58_vm1 = vcmask 31744   ;;  %v2067_v5 = vmov 0.0   ;;  %v2068_v23 = vmov 0   ;;  %s2572_s0 = inlined_call_operand.vmem [shape: f32[4,256], index: 0, kind: input, shape index: {}]   ;;  %s2573_s1 = inlined_call_operand.vmem [shape: f32[32,4], index: 1, kind: input, shape index: {}]   ;;  %s2574_s2 = inlined_call_operand.vmem [shape: f32[32,1], index: 2, kind: input, shape index: {}]   ;;  %s2575_s3 = inlined_call_operand.vmem [shape: f32[32,32], index: 3, kind: input, shape index: {}]   ;;  %s2576_s4 = inlined_call_operand.vmem [shape: f32[32,1], index: 4, kind: input, shape index: {}]   ;;  %s2577_s5 = inlined_call_operand.vmem [shape: f32[4,32], index: 5, kind: input, shape index: {}]   ;;  %s2578_s6 = inlined_call_operand.vmem [shape: f32[4,1], index: 6, kind: input, shape index: {}]   ;;  %s2579_s7 = inlined_call_operand.hbm [shape: f32[4,256], index: 7, kind: output, shape index: {}]  }
   0x1   :  { %v27_v0 = vld [vmem:[%s2572_s0] sm:$0xff]  ;;  %v29_v2 = vld [vmem:[%s2573_s1 + $0x8] sm:$0xff]  ;;  %142 = vmatprep.mubr.f32.mxu0 %v2067_v5  ;;  %261 = vmatprep.mubr.f32.mxu1 %v2067_v5  ;;  %v30_v8 = vld [vmem:[%s2573_s1 + $0x10] sm:$0xff] }
   0x2   :  { %v28_v1 = vld [vmem:[%s2573_s1] sm:$0xff]  ;;  %v57_v3 = vcombine.high %v27_v0, %v27_v0  ;;  %v72_v4 = vsel %vm71_vm0, %v27_v0, 0  ;;  %v63_v7 = vsel %vm58_vm1, %v29_v2, 0  ;;  %v31_v9 = vld [vmem:[%s2573_s1 + $0x18] sm:$0xff]  ;;  %v66_v13 = vsel %vm58_vm1, %v30_v8, 0  ;;  %v33_v14 = vld [vmem:[%s2574_s2 + $0x8] sm:$0xff]  ;;  %2011 = vset.pattern.permute.xlu1 %v2068_v23  ;;  %2010 = vset.pattern.permute.xlu0 %v2068_v23 }
   0x3   :  { %v60_v6 = vsel %vm58_vm1, %v28_v1, 0  ;;  %v2130_v10 = vand.u32 4294901760, %v72_v4  ;;  %v2134_v12 = vand.u32 4294901760, %v63_v7  ;;  %v35_v15 = vld [vmem:[%s2574_s2 + $0x18] sm:$0xff]  ;;  %v2144_v17 = vand.u32 4294901760, %v66_v13  ;;  %43 = vperm.xlu1 %2011, %v33_v14  }
   0x4   :  { %v2132_v11 = vand.u32 4294901760, %v60_v6  ;;  %v74_v16 = vsel %vm71_vm0, %v57_v3, 0  ;;  %v69_v18 = vsel %vm58_vm1, %v31_v9, 0  ;;  %53 = vperm.xlu0 %2010, %v35_v15  }
   0x5   :  { %v106_v19 = vand.u32 4294901760, %v74_v16  ;;  %v2151_v21 = vsub.f32 %v72_v4, %v2130_v10  ;;  %v2154_v22 = vsub.f32 %v63_v7, %v2134_v12  ;;  %v2157_v24 = vsub.f32 %v66_v13, %v2144_v17 }
   0x6   :  { %v2148_v20 = vsub.f32 %v60_v6, %v2132_v11  ;;  %v2159_v25 = vand.u32 4294901760, %v69_v18 }
   0x7   :  { %12 = vsyncpa [#allocation3], 0  ;;  %107 = vmatprep.subr.mxu0 %v106_v19  ;;  %v218_v27 = vsub.f32 %v74_v16, %v106_v19  ;;  %v225_v28 = vand.u32 4294901760, %v2151_v21  ;;  %v156_v29 = vand.u32 4294901760, %v2154_v22  ;;  %v32_v30 = vld [vmem:[%s2574_s2] sm:$0xff]  ;;  %v34_v31 = vld [vmem:[%s2574_s2 + $0x10] sm:$0xff] }
   0x8   :  { %v145_v26 = vand.u32 4294901760, %v2148_v20  ;;  %109 = vmatpush1.msra.mxu0 %v2130_v10  ;;  %v167_v32 = vand.u32 4294901760, %v2157_v24  ;;  %v2173_v33 = vsub.f32 %v69_v18, %v2159_v25  ;;  %38 = vperm.xlu1 %2011, %v32_v30   ;;  %v703_v45 = vld [vmem:[%s2576_s4 + $0x18] sm:$0xff]  ;;  %v702_v46 = vld [vmem:[%s2576_s4 + $0x10] sm:$0xff]  ;;  %v701_v49 = vld [vmem:[%s2576_s4 + $0x8] sm:$0xff]  ;;  %vm724_vm2 = vcmask 261120  }
   0x9   :  { %v219_v35 = vand.u32 4294901760, %v218_v27  ;;  %v226_v36 = vsub.f32 %v2151_v21, %v225_v28  ;;  %v157_v37 = vsub.f32 %v2154_v22, %v156_v29  ;;  %322 = vmatprep.subr.mxu0 %v218_v27  ;;  %48 = vperm.xlu0 %2010, %v34_v31   ;;  %v700_v50 = vld [vmem:[%s2576_s4] sm:$0xff] }
   0xa   :  { %v146_v34 = vsub.f32 %v2148_v20, %v145_v26  ;;  %v168_v43 = vsub.f32 %v2157_v24, %v167_v32  ;;  %v178_v44 = vand.u32 4294901760, %v2173_v33  ;;  %v1436_v52 = vld [vmem:[%s2578_s6] sm:$0xf] }
   0xb   :  { %v220_v39 = vsub.f32 %v218_v27, %v219_v35  ;;  %v227_v40 = vand.u32 4294901760, %v226_v36  ;;  %v158_v42 = vand.u32 4294901760, %v157_v37 }
   0xc   :  { %v147_v38 = vand.u32 4294901760, %v146_v34  ;;  %v169_v47 = vand.u32 4294901760, %v168_v43  ;;  %v179_v48 = vsub.f32 %v2173_v33, %v178_v44  ;;  %716 = vperm.xlu1 %2011, %v702_v46  }
   0xd   :  { %v221_v41 = vand.u32 4294901760, %v220_v39  ;;  %721 = vperm.xlu0 %2010, %v703_v45  }
   0xe   :  { %148 = vmatmul.mubr.f32.vlgmr.msra.gmra.mxu0 %v147_v38  ;;  %v180_v51 = vand.u32 4294901760, %v179_v48 }
   0xf   :  { %153 = vmatprep.mubr.f32.mxu0 %v2067_v5  ;;  %325 = vmatpush1.msra.mxu0 %v2151_v21 }
  0x10   :  { %222 = vmatprep.subr.mxu1 %v221_v41  ;;  %527 = vmatprep.subr.mxu0 %v219_v35 }
  0x11   :  { %228 = vmatpush1.msra.mxu1 %v227_v40  ;;  %711 = vperm.xlu0 %2010, %v701_v49  }
  0x12   :  { %159 = vmatmul.mubr.f32.gmra.mxu0 %v158_v42  ;;  %263 = vmatmul.mubr.f32.vlgmr.msra.gmra.mxu1 %v2132_v11 }
  0x13   :  { %164 = vmatprep.mubr.f32.mxu0 %v2067_v5  ;;  %268 = vmatprep.mubr.f32.mxu1 %v2067_v5 }
  0x14   :  { %422 = vmatprep.subr.mxu1 %v106_v19  ;;  %706 = vperm.xlu1 %2011, %v700_v50  }
  0x15   :  { %424 = vmatpush1.msra.mxu1 %v2130_v10  ;;  %1439 = vperm.xlu0 %2010, %v1436_v52  }
  0x16   :  { %170 = vmatmul.mubr.f32.gmra.mxu0 %v169_v47  ;;  %270 = vmatmul.mubr.f32.gmra.mxu1 %v2134_v12 }
  0x17   :  { %175 = vmatprep.mubr.f32.mxu0 %v2067_v5  ;;  %275 = vmatprep.mubr.f32.mxu1 %v2067_v5 }
  0x18   :  { %624 = vmatprep.subr.mxu1 %v106_v19 }
  0x1a   :  { %181 = vmatmul.mubr.f32.gmra.mxu0 %v180_v51  ;;  %277 = vmatmul.mubr.f32.gmra.mxu1 %v2144_v17 }
  0x1b   :  { %282 = vmatprep.mubr.f32.mxu1 %v2067_v5  ;;  %358 = vmatprep.mubr.f32.mxu0 %v2067_v5 }
  0x1e   :  { %284 = vmatmul.mubr.f32.gmra.mxu1 %v2159_v25  ;;  %361 = vmatmul.mubr.f32.vlgmr.msra.gmra.mxu0 %v2148_v20 }
  0x1f   :  { %366 = vmatprep.mubr.f32.mxu0 %v2067_v5  ;;  %457 = vmatprep.mubr.f32.mxu1 %v2067_v5 }
  0x20   :  { %531 = vmatpush1.msra.mxu0 %v225_v28 }
  0x22   :  { %369 = vmatmul.mubr.f32.gmra.mxu0 %v2154_v22  ;;  %461 = vmatmul.mubr.f32.vlgmr.msra.gmra.mxu1 %v145_v26 }
  0x23   :  { %374 = vmatprep.mubr.f32.mxu0 %v2067_v5  ;;  %466 = vmatprep.mubr.f32.mxu1 %v2067_v5 }
  0x24   :  { %626 = vmatpush1.msra.mxu1 %v2130_v10 }
  0x26   :  { %377 = vmatmul.mubr.f32.gmra.mxu0 %v2157_v24  ;;  %470 = vmatmul.mubr.f32.gmra.mxu1 %v156_v29 }
  0x27   :  { %382 = vmatprep.mubr.f32.mxu0 %v2067_v5  ;;  %475 = vmatprep.mubr.f32.mxu1 %v2067_v5 }
  0x2a   :  { %385 = vmatmul.mubr.f32.gmra.mxu0 %v2173_v33  ;;  %479 = vmatmul.mubr.f32.gmra.mxu1 %v167_v32 }
  0x2b   :  { %484 = vmatprep.mubr.f32.mxu1 %v2067_v5  ;;  %564 = vmatprep.mubr.f32.mxu0 %v2067_v5 }
  0x2e   :  { %488 = vmatmul.mubr.f32.gmra.mxu1 %v178_v44  ;;  %566 = vmatmul.mubr.f32.vlgmr.msra.gmra.mxu0 %v2132_v11 }
  0x2f   :  { %571 = vmatprep.mubr.f32.mxu0 %v2067_v5  ;;  %659 = vmatprep.mubr.f32.mxu1 %v2067_v5 }
  0x32   :  { %573 = vmatmul.mubr.f32.gmra.mxu0 %v2134_v12  ;;  %661 = vmatmul.mubr.f32.vlgmr.msra.gmra.mxu1 %v2132_v11 }
  0x33   :  { %578 = vmatprep.mubr.f32.mxu0 %v2067_v5  ;;  %666 = vmatprep.mubr.f32.mxu1 %v2067_v5 }
  0x36   :  { %580 = vmatmul.mubr.f32.gmra.mxu0 %v2144_v17  ;;  %668 = vmatmul.mubr.f32.gmra.mxu1 %v2134_v12 }
  0x37   :  { %585 = vmatprep.mubr.f32.mxu0 %v2067_v5  ;;  %673 = vmatprep.mubr.f32.mxu1 %v2067_v5 }
  0x3a   :  { %587 = vmatmul.mubr.f32.gmra.mxu0 %v2159_v25  ;;  %675 = vmatmul.mubr.f32.gmra.mxu1 %v2144_v17 }
  0x3b   :  { %680 = vmatprep.mubr.f32.mxu1 %v2067_v5  ;;  %809 = vmatprep.mubr.f32.mxu0 %v2067_v5 }
  0x3e   :  { %682 = vmatmul.mubr.f32.gmra.mxu1 %v2159_v25 }
  0x3f   :  { %958 = vmatprep.mubr.f32.mxu1 %v2067_v5 }
  0x7e   :  { %v44_v17 = vpop.permute.xlu1 %43 }
  0x7f   :  { %v54_v12 = vpop.permute.xlu0 %53 }
  0x83   :  { %v39_v26 = vpop.permute.xlu1 %38 }
  0x84   :  { %v49_v20 = vpop.permute.xlu0 %48 }
  0xce   :  { %v149_v53 = vpop.f32.mrf.mxu0 }
  0xcf   :  { %v150_v32 = vadd.f32 %v149_v53, %v39_v26 }
  0xd0   :  { %v151_v54 = vpop.f32.mrf.mxu0 }
  0xd1   :  { %v152_v33 = vadd.f32 %v151_v54, %v39_v26 }
  0xd2   :  { %v160_v55 = vpop.f32.mrf.mxu0  ;;  %v264_v56 = vpop.f32.mrf.mxu1 }
  0xd3   :  { %v161_v21 = vadd.f32 %v160_v55, %v44_v17  ;;  %v265_v48 = vadd.f32 %v264_v56, %v150_v32 }
  0xd4   :  { %v162_v57 = vpop.f32.mrf.mxu0  ;;  %v266_v58 = vpop.f32.mrf.mxu1 }
  0xd5   :  { %v163_v28 = vadd.f32 %v162_v57, %v44_v17  ;;  %v267_v41 = vadd.f32 %v266_v58, %v152_v33 }
  0xd6   :  { %v171_v59 = vpop.f32.mrf.mxu0  ;;  %v271_v60 = vpop.f32.mrf.mxu1 }
  0xd7   :  { %v172_v27 = vadd.f32 %v171_v59, %v49_v20  ;;  %v272_v29 = vadd.f32 %v271_v60, %v161_v21 }
  0xd8   :  { %v173_v61 = vpop.f32.mrf.mxu0  ;;  %v273_v62 = vpop.f32.mrf.mxu1 }
  0xd9   :  { %v274_v34 = vadd.f32 %v273_v62, %v163_v28  ;;  %v174_v38 = vadd.f32 %v173_v61, %v49_v20 }
  0xda   :  { %v182_v63 = vpop.f32.mrf.mxu0  ;;  %v278_v0 = vpop.f32.mrf.mxu1 }
  0xdb   :  { %v183_v39 = vadd.f32 %v182_v63, %v54_v12  ;;  %v279_v40 = vadd.f32 %v278_v0, %v172_v27 }
  0xdc   :  { %v184_v1 = vpop.f32.mrf.mxu0  ;;  %v280_v2 = vpop.f32.mrf.mxu1 }
  0xdd   :  { %v281_v46 = vadd.f32 %v280_v2, %v174_v38  ;;  %v185_v54 = vadd.f32 %v184_v1, %v54_v12 }
  0xde   :  { %v285_v3 = vpop.f32.mrf.mxu1  ;;  %v362_v4 = vpop.f32.mrf.mxu0 }
  0xdf   :  { %v286_v55 = vadd.f32 %v285_v3, %v183_v39  ;;  %v363_v60 = vadd.f32 %v362_v4, %v265_v48 }
  0xe0   :  { %v287_v6 = vpop.f32.mrf.mxu1  ;;  %v364_v7 = vpop.f32.mrf.mxu0 }
  0xe1   :  { %v365_v49 = vadd.f32 %v364_v7, %v267_v41 }
  0xe2   :  { %v370_v8 = vpop.f32.mrf.mxu0  ;;  %v462_v9 = vpop.f32.mrf.mxu1 }
  0xe3   :  { %v371_v35 = vadd.f32 %v370_v8, %v272_v29  ;;  %v288_v8 = vadd.f32 %v287_v6, %v185_v54  ;;  %v463_v56 = vadd.f32 %v462_v9, %v363_v60 }
  0xe4   :  { %v372_v10 = vpop.f32.mrf.mxu0  ;;  %v464_v11 = vpop.f32.mrf.mxu1 }
  0xe5   :  { %v373_v42 = vadd.f32 %v372_v10, %v274_v34  ;;  %v465_v61 = vadd.f32 %v464_v11, %v365_v49 }
  0xe6   :  { %v378_v13 = vpop.f32.mrf.mxu0  ;;  %v471_v14 = vpop.f32.mrf.mxu1 }
  0xe7   :  { %v472_v43 = vadd.f32 %v471_v14, %v371_v35  ;;  %v379_v47 = vadd.f32 %v378_v13, %v279_v40 }
  0xe8   :  { %v380_v15 = vpop.f32.mrf.mxu0  ;;  %v473_v16 = vpop.f32.mrf.mxu1 }
  0xe9   :  { %v474_v50 = vadd.f32 %v473_v16, %v373_v42  ;;  %v381_v57 = vadd.f32 %v380_v15, %v281_v46 }
  0xea   :  { %v386_v18 = vpop.f32.mrf.mxu0  ;;  %v480_v19 = vpop.f32.mrf.mxu1 }
  0xeb   :  { %v481_v59 = vadd.f32 %v480_v19, %v379_v47  ;;  %v387_v10 = vadd.f32 %v386_v18, %v286_v55 }
  0xec   :  { %v388_v22 = vpop.f32.mrf.mxu0  ;;  %v482_v23 = vpop.f32.mrf.mxu1 }
  0xed   :  { %v483_v2 = vadd.f32 %v482_v23, %v381_v57  ;;  %v389_v20 = vadd.f32 %v388_v22, %v288_v8 }
  0xee   :  { %v489_v24 = vpop.f32.mrf.mxu1  ;;  %v567_v25 = vpop.f32.mrf.mxu0 }
  0xef   :  { %v490_v1 = vadd.f32 %v489_v24, %v387_v10  ;;  %v568_v15 = vadd.f32 %v567_v25, %v463_v56  ;;  %v696_v24 = vld [vmem:[%s2575_s3] sm:$0xff] }
  0xf0   :  { %v491_v30 = vpop.f32.mrf.mxu1  ;;  %v569_v31 = vpop.f32.mrf.mxu0  ;;  %v726_v28 = vsel %vm724_vm2, %v696_v24, 0 }
  0xf1   :  { %v570_v7 = vadd.f32 %v569_v31, %v465_v61  ;;  %v492_v21 = vadd.f32 %v491_v30, %v389_v20  ;;  %v2251_v29 = vand.u32 4294901760, %v726_v28  ;;  %v697_v30 = vld [vmem:[%s2575_s3 + $0x8] sm:$0xff] }
  0xf2   :  { %v574_v36 = vpop.f32.mrf.mxu0  ;;  %v662_v37 = vpop.f32.mrf.mxu1  ;;  %v729_v32 = vsel %vm724_vm2, %v697_v30, 0 }
  0xf3   :  { %v575_v51 = vadd.f32 %v574_v36, %v472_v43  ;;  %v663_v18 = vadd.f32 %v662_v37, %v568_v15  ;;  %v2258_v34 = vsub.f32 %v726_v28, %v2251_v29  ;;  %v698_v36 = vld [vmem:[%s2575_s3 + $0x10] sm:$0xff]  ;;  %v2263_v38 = vand.u32 4294901760, %v729_v32 }
  0xf4   :  { %v576_v44 = vpop.f32.mrf.mxu0  ;;  %v664_v45 = vpop.f32.mrf.mxu1 }
  0xf5   :  { %v577_v62 = vadd.f32 %v576_v44, %v474_v50  ;;  %v665_v4 = vadd.f32 %v664_v45, %v570_v7  ;;  %v812_v44 = vand.u32 4294901760, %v2258_v34  ;;  %v732_v45 = vsel %vm724_vm2, %v698_v36, 0  ;;  %v699_v50 = vld [vmem:[%s2575_s3 + $0x18] sm:$0xff] }
  0xf6   :  { %v581_v52 = vpop.f32.mrf.mxu0  ;;  %v669_v53 = vpop.f32.mrf.mxu1 }
  0xf7   :  { %v670_v58 = vadd.f32 %v669_v53, %v575_v51  ;;  %v582_v13 = vadd.f32 %v581_v52, %v481_v59  ;;  %v2286_v53 = vsub.f32 %v729_v32, %v2263_v38  ;;  %v2296_v59 = vand.u32 4294901760, %v732_v45 }
  0xf8   :  { %v583_v63 = vpop.f32.mrf.mxu0  ;;  %v671_v0 = vpop.f32.mrf.mxu1  ;;  %v813_v61 = vsub.f32 %v2258_v34, %v812_v44 }
  0xf9   :  { %v672_v14 = vadd.f32 %v671_v0, %v577_v62  ;;  %v584_v3 = vadd.f32 %v583_v63, %v483_v2  ;;  %2013 = vtanh.f32 %v670_v58  ;;  %v735_v58 = vsel %vm724_vm2, %v699_v50, 0 }
  0xfa   :  { %v588_v16 = vpop.f32.mrf.mxu0  ;;  %v676_v17 = vpop.f32.mrf.mxu1  ;;  %v823_v2 = vand.u32 4294901760, %v2286_v53 }
  0xfb   :  { %v677_v12 = vadd.f32 %v676_v17, %v582_v13  ;;  %v589_v26 = vadd.f32 %v588_v16, %v490_v1  ;;  %v2327_v16 = vand.u32 4294901760, %v735_v58 }
  0xfc   :  { %v590_v11 = vpop.f32.mrf.mxu0  ;;  %v678_v19 = vpop.f32.mrf.mxu1 }
  0xfd   :  { %2015 = vtanh.f32 %v677_v12  ;;  %v679_v6 = vadd.f32 %v678_v19, %v584_v3  ;;  %v591_v23 = vadd.f32 %v590_v11, %v492_v21  ;;  %v814_v3 = vand.u32 4294901760, %v813_v61 }
  0xfe   :  { %2017 = vtanh.f32 %v672_v14  ;;  %v683_v9 = vpop.f32.mrf.mxu1  ;;  %v2325_v14 = vsub.f32 %v732_v45, %v2296_v59  ;;  %v824_v11 = vsub.f32 %v2286_v53, %v823_v2 }
  0xff   :  { %2019 = vtanh.f32 %v679_v6  ;;  %v684_v27 = vadd.f32 %v683_v9, %v589_v26 }
 0x100   :  { %2021 = vtanh.f32 %v665_v4  ;;  %v685_v22 = vpop.f32.mrf.mxu1  ;;  %v834_v6 = vand.u32 4294901760, %v2325_v14 }
 0x101   :  { %2023 = vtanh.f32 %v684_v27  ;;  %v686_v25 = vadd.f32 %v685_v22, %v591_v23 }
 0x102   :  { %2025 = vtanh.f32 %v663_v18  ;;  %v2354_v18 = vsub.f32 %v735_v58, %v2327_v16 }
 0x103   :  { %2027 = vtanh.f32 %v686_v25  ;;  %v825_v25 = vand.u32 4294901760, %v824_v11 }
 0x104   :  { %v845_v32 = vand.u32 4294901760, %v2354_v18 }
 0x106   :  { %v2014_v31 = vpop.eup %2013 }
 0x107   :  { %v2275_v48 = vand.u32 4294901760, %v2014_v31 }
 0x109   :  { %v2314_v10 = vsub.f32 %v2014_v31, %v2275_v48  ;;  %v835_v31 = vsub.f32 %v2325_v14, %v834_v6 }
 0x10a   :  { %v2016_v33 = vpop.eup %2015 }
 0x10b   :  { %v2018_v35 = vpop.eup %2017  ;;  %v2267_v41 = vand.u32 4294901760, %v2016_v33  ;;  %v910_v4 = vand.u32 4294901760, %v2314_v10 }
 0x10c   :  { %v2020_v37 = vpop.eup %2019  ;;  %v2269_v43 = vand.u32 4294901760, %v2018_v35 }
 0x10d   :  { %v2022_v39 = vpop.eup %2021  ;;  %v2265_v40 = vand.u32 4294901760, %v2020_v37  ;;  %v2294_v57 = vsub.f32 %v2016_v33, %v2267_v41  ;;  %v911_v24 = vsub.f32 %v2314_v10, %v910_v4 }
 0x10e   :  { %v2024_v42 = vpop.eup %2023  ;;  %v2283_v52 = vand.u32 4294901760, %v2022_v39  ;;  %v2304_v62 = vsub.f32 %v2018_v35, %v2269_v43 }
 0x10f   :  { %v2026_v46 = vpop.eup %2025  ;;  %v2273_v47 = vand.u32 4294901760, %v2024_v42  ;;  %v2278_v49 = vsub.f32 %v2020_v37, %v2265_v40  ;;  %v898_v7 = vand.u32 4294901760, %v2294_v57  ;;  %v912_v36 = vand.u32 4294901760, %v911_v24 }
 0x110   :  { %v2028_v51 = vpop.eup %2027  ;;  %v2298_v60 = vand.u32 4294901760, %v2026_v46  ;;  %v2319_v13 = vsub.f32 %v2022_v39, %v2283_v52  ;;  %v904_v20 = vand.u32 4294901760, %v2304_v62  ;;  %v836_v39 = vand.u32 4294901760, %v835_v31 }
 0x111   :  { %v2288_v54 = vand.u32 4294901760, %v2028_v51  ;;  %v2291_v55 = vsub.f32 %v2024_v42, %v2273_v47  ;;  %v892_v8 = vand.u32 4294901760, %v2278_v49  ;;  %v899_v26 = vsub.f32 %v2294_v57, %v898_v7 }
 0x112   :  { %v2335_v1 = vsub.f32 %v2026_v46, %v2298_v60  ;;  %v916_v19 = vand.u32 4294901760, %v2319_v13  ;;  %v905_v23 = vsub.f32 %v2304_v62, %v904_v20  ;;  %v846_v42 = vsub.f32 %v2354_v18, %v845_v32 }
 0x113   :  { %762 = vmatprep.subr.mxu0 %v2288_v54  ;;  %v2309_v63 = vsub.f32 %v2028_v51, %v2288_v54  ;;  %v886_v0 = vand.u32 4294901760, %v2291_v55  ;;  %v893_v15 = vsub.f32 %v2278_v49, %v892_v8  ;;  %v900_v30 = vand.u32 4294901760, %v899_v26 }
 0x114   :  { %764 = vmatpush1.msra.mxu0 %v2273_v47  ;;  %v922_v27 = vand.u32 4294901760, %v2335_v1  ;;  %v917_v28 = vsub.f32 %v2319_v13, %v916_v19  ;;  %v906_v33 = vand.u32 4294901760, %v905_v23  ;;  %v847_v46 = vand.u32 4294901760, %v846_v42 }
 0x115   :  { %766 = vmatprep.subr.mxu0 %v2265_v40  ;;  %v880_v56 = vand.u32 4294901760, %v2309_v63  ;;  %v887_v17 = vsub.f32 %v2291_v55, %v886_v0  ;;  %v894_v22 = vand.u32 4294901760, %v893_v15 }
 0x116   :  { %768 = vmatpush1.msra.mxu0 %v2267_v41  ;;  %v923_v35 = vsub.f32 %v2335_v1, %v922_v27  ;;  %v918_v37 = vand.u32 4294901760, %v917_v28 }
 0x117   :  { %770 = vmatprep.subr.mxu0 %v2269_v43  ;;  %v881_v12 = vsub.f32 %v2309_v63, %v880_v56  ;;  %v888_v9 = vand.u32 4294901760, %v887_v17 }
 0x118   :  { %772 = vmatpush1.msra.mxu0 %v2275_v48  ;;  %v924_v45 = vand.u32 4294901760, %v923_v35 }
 0x119   :  { %774 = vmatprep.subr.mxu0 %v2283_v52  ;;  %v882_v21 = vand.u32 4294901760, %v881_v12 }
 0x11a   :  { %776 = vmatpush1.msra.mxu0 %v2298_v60 }
 0x11b   :  { %815 = vmatmul.mubr.f32.vlgmr.msra.gmra.mxu0 %v814_v3  ;;  %883 = vmatprep.subr.mxu1 %v882_v21 }
 0x11c   :  { %1013 = vmatprep.subr.mxu0 %v2309_v63  ;;  %889 = vmatpush1.msra.mxu1 %v888_v9 }
 0x11d   :  { %1016 = vmatpush1.msra.mxu0 %v2291_v55  ;;  %895 = vmatprep.subr.mxu1 %v894_v22 }
 0x11e   :  { %1019 = vmatprep.subr.mxu0 %v2278_v49  ;;  %820 = vmatprep.mubr.f32.mxu0 %v2067_v5 }
 0x11f   :  { %901 = vmatpush1.msra.mxu1 %v900_v30  ;;  %1022 = vmatpush1.msra.mxu0 %v2294_v57 }
 0x120   :  { %826 = vmatmul.mubr.f32.gmra.mxu0 %v825_v25  ;;  %907 = vmatprep.subr.mxu1 %v906_v33 }
 0x121   :  { %1025 = vmatprep.subr.mxu0 %v2304_v62  ;;  %913 = vmatpush1.msra.mxu1 %v912_v36 }
 0x122   :  { %1028 = vmatpush1.msra.mxu0 %v2314_v10  ;;  %919 = vmatprep.subr.mxu1 %v918_v37  ;;  %v717_v10 = vpop.permute.xlu1 %716 }
 0x123   :  { %1031 = vmatprep.subr.mxu0 %v2319_v13  ;;  %831 = vmatprep.mubr.f32.mxu0 %v2067_v5 }
 0x124   :  { %925 = vmatpush1.msra.mxu1 %v924_v45  ;;  %1034 = vmatpush1.msra.mxu0 %v2335_v1 }
 0x125   :  { %837 = vmatmul.mubr.f32.gmra.mxu0 %v836_v39  ;;  %960 = vmatmul.mubr.f32.vlgmr.msra.gmra.mxu1 %v2251_v29 }
 0x126   :  { %1125 = vmatprep.subr.mxu1 %v2288_v54  ;;  %1236 = vmatprep.subr.mxu0 %v880_v56  ;;  %v722_v56 = vpop.permute.xlu0 %721 }
 0x127   :  { %1127 = vmatpush1.msra.mxu1 %v2273_v47  ;;  %842 = vmatprep.mubr.f32.mxu0 %v2067_v5 }
 0x128   :  { %1129 = vmatprep.subr.mxu1 %v2265_v40  ;;  %965 = vmatprep.mubr.f32.mxu1 %v2067_v5 }
 0x129   :  { %1131 = vmatpush1.msra.mxu1 %v2267_v41  ;;  %848 = vmatmul.mubr.f32.gmra.mxu0 %v847_v46 }
 0x12a   :  { %967 = vmatmul.mubr.f32.gmra.mxu1 %v2263_v38  ;;  %1133 = vmatprep.subr.mxu1 %v2269_v43  ;;  %v712_v15 = vpop.permute.xlu0 %711 }
 0x12b   :  { %1135 = vmatpush1.msra.mxu1 %v2275_v48  ;;  %972 = vmatprep.mubr.f32.mxu1 %v2067_v5 }
 0x12c   :  { %1137 = vmatprep.subr.mxu1 %v2283_v52  ;;  %1067 = vmatprep.mubr.f32.mxu0 %v2067_v5 }
 0x12d   :  { %1139 = vmatpush1.msra.mxu1 %v2298_v60  ;;  %1070 = vmatmul.mubr.f32.vlgmr.msra.gmra.mxu0 %v2258_v34 }
 0x12e   :  { %974 = vmatmul.mubr.f32.gmra.mxu1 %v2296_v59  ;;  %1240 = vmatpush1.msra.mxu0 %v886_v0 }
 0x12f   :  { %1351 = vmatprep.subr.mxu1 %v2288_v54  ;;  %1244 = vmatprep.subr.mxu0 %v892_v8 }
 0x130   :  { %1248 = vmatpush1.msra.mxu0 %v898_v7  ;;  %979 = vmatprep.mubr.f32.mxu1 %v2067_v5 }
 0x131   :  { %1075 = vmatprep.mubr.f32.mxu0 %v2067_v5  ;;  %1252 = vmatprep.subr.mxu0 %v904_v20  ;;  %v707_v20 = vpop.permute.xlu1 %706 }
 0x132   :  { %981 = vmatmul.mubr.f32.gmra.mxu1 %v2327_v16  ;;  %1078 = vmatmul.mubr.f32.gmra.mxu0 %v2286_v53 }
 0x133   :  { %1256 = vmatpush1.msra.mxu0 %v910_v4  ;;  %1083 = vmatprep.mubr.f32.mxu0 %v2067_v5 }
 0x134   :  { %1260 = vmatprep.subr.mxu0 %v916_v19  ;;  %1172 = vmatprep.mubr.f32.mxu1 %v2067_v5 }
 0x135   :  { %1264 = vmatpush1.msra.mxu0 %v922_v27 }
 0x136   :  { %1086 = vmatmul.mubr.f32.gmra.mxu0 %v2325_v14  ;;  %1176 = vmatmul.mubr.f32.vlgmr.msra.gmra.mxu1 %v812_v44 }
 0x137   :  { %1353 = vmatpush1.msra.mxu1 %v2273_v47  ;;  %1091 = vmatprep.mubr.f32.mxu0 %v2067_v5 }
 0x138   :  { %1355 = vmatprep.subr.mxu1 %v2265_v40  ;;  %1181 = vmatprep.mubr.f32.mxu1 %v2067_v5 }
 0x139   :  { %1357 = vmatpush1.msra.mxu1 %v2267_v41 }
 0x13a   :  { %1359 = vmatprep.subr.mxu1 %v2269_v43  ;;  %1094 = vmatmul.mubr.f32.gmra.mxu0 %v2354_v18 }
 0x13b   :  { %1185 = vmatmul.mubr.f32.gmra.mxu1 %v823_v2  ;;  %1297 = vmatprep.mubr.f32.mxu0 %v2067_v5 }
 0x13c   :  { %1361 = vmatpush1.msra.mxu1 %v2275_v48  ;;  %1190 = vmatprep.mubr.f32.mxu1 %v2067_v5 }
 0x13d   :  { %1363 = vmatprep.subr.mxu1 %v2283_v52 }
 0x13e   :  { %1365 = vmatpush1.msra.mxu1 %v2298_v60  ;;  %1299 = vmatmul.mubr.f32.vlgmr.msra.gmra.mxu0 %v2251_v29 }
 0x13f   :  { %1194 = vmatmul.mubr.f32.gmra.mxu1 %v834_v6  ;;  %1304 = vmatprep.mubr.f32.mxu0 %v2067_v5 }
 0x140   :  { %1199 = vmatprep.mubr.f32.mxu1 %v2067_v5 }
 0x142   :  { %1306 = vmatmul.mubr.f32.gmra.mxu0 %v2263_v38 }
 0x143   :  { %1203 = vmatmul.mubr.f32.gmra.mxu1 %v845_v32  ;;  %1311 = vmatprep.mubr.f32.mxu0 %v2067_v5 }
 0x144   :  { %1398 = vmatprep.mubr.f32.mxu1 %v2067_v5 }
 0x146   :  { %1313 = vmatmul.mubr.f32.gmra.mxu0 %v2296_v59 }
 0x147   :  { %1400 = vmatmul.mubr.f32.vlgmr.msra.gmra.mxu1 %v2251_v29  ;;  %1318 = vmatprep.mubr.f32.mxu0 %v2067_v5 }
 0x148   :  { %1405 = vmatprep.mubr.f32.mxu1 %v2067_v5 }
 0x14a   :  { %1320 = vmatmul.mubr.f32.gmra.mxu0 %v2327_v16 }
 0x14b   :  { %1407 = vmatmul.mubr.f32.gmra.mxu1 %v2263_v38  ;;  %1517 = vmatprep.mubr.f32.mxu0 %v2067_v5 }
 0x14c   :  { %1412 = vmatprep.mubr.f32.mxu1 %v2067_v5 }
 0x14f   :  { %1414 = vmatmul.mubr.f32.gmra.mxu1 %v2296_v59 }
 0x150   :  { %1419 = vmatprep.mubr.f32.mxu1 %v2067_v5 }
 0x153   :  { %1421 = vmatmul.mubr.f32.gmra.mxu1 %v2327_v16 }
 0x154   :  { %1633 = vmatprep.mubr.f32.mxu1 %v2067_v5 }
 0x1db   :  { %v816_v29 = vpop.f32.mrf.mxu0 }
 0x1dc   :  { %v817_v22 = vadd.f32 %v816_v29, %v707_v20 }
 0x1dd   :  { %v818_v34 = vpop.f32.mrf.mxu0 }
 0x1de   :  { %v819_v3 = vadd.f32 %v818_v34, %v707_v20 }
 0x1e0   :  { %v827_v40 = vpop.f32.mrf.mxu0 }
 0x1e1   :  { %v828_v26 = vadd.f32 %v827_v40, %v712_v15 }
 0x1e2   :  { %v829_v41 = vpop.f32.mrf.mxu0 }
 0x1e3   :  { %v830_v11 = vadd.f32 %v829_v41, %v712_v15 }
 0x1e5   :  { %v838_v43 = vpop.f32.mrf.mxu0  ;;  %v961_v44 = vpop.f32.mrf.mxu1 }
 0x1e6   :  { %v839_v18 = vadd.f32 %v838_v43, %v717_v10  ;;  %v962_v33 = vadd.f32 %v961_v44, %v817_v22 }
 0x1e7   :  { %v840_v47 = vpop.f32.mrf.mxu0  ;;  %v963_v38 = vpop.f32.mrf.mxu1 }
 0x1e8   :  { %v964_v19 = vadd.f32 %v963_v38, %v819_v3  ;;  %v841_v28 = vadd.f32 %v840_v47, %v717_v10 }
 0x1e9   :  { %v849_v48 = vpop.f32.mrf.mxu0 }
 0x1ea   :  { %v968_v49 = vpop.f32.mrf.mxu1  ;;  %v850_v35 = vadd.f32 %v849_v48, %v722_v56 }
 0x1eb   :  { %v851_v50 = vpop.f32.mrf.mxu0  ;;  %v969_v24 = vadd.f32 %v968_v49, %v828_v26 }
 0x1ec   :  { %v970_v51 = vpop.f32.mrf.mxu1  ;;  %v852_v40 = vadd.f32 %v851_v50, %v722_v56 }
 0x1ed   :  { %v1071_v52 = vpop.f32.mrf.mxu0  ;;  %v971_v9 = vadd.f32 %v970_v51, %v830_v11 }
 0x1ee   :  { %v975_v53 = vpop.f32.mrf.mxu1  ;;  %v1072_v41 = vadd.f32 %v1071_v52, %v962_v33 }
 0x1ef   :  { %v1073_v54 = vpop.f32.mrf.mxu0  ;;  %v976_v30 = vadd.f32 %v975_v53, %v839_v18 }
 0x1f0   :  { %v977_v55 = vpop.f32.mrf.mxu1  ;;  %v1074_v23 = vadd.f32 %v1073_v54, %v964_v19 }
 0x1f1   :  { %v978_v42 = vadd.f32 %v977_v55, %v841_v28 }
 0x1f2   :  { %v982_v57 = vpop.f32.mrf.mxu1  ;;  %v1079_v59 = vpop.f32.mrf.mxu0 }
 0x1f3   :  { %v1080_v36 = vadd.f32 %v1079_v59, %v969_v24  ;;  %v983_v43 = vadd.f32 %v982_v57, %v850_v35 }
 0x1f4   :  { %v984_v60 = vpop.f32.mrf.mxu1  ;;  %v1081_v61 = vpop.f32.mrf.mxu0 }
 0x1f5   :  { %v1082_v31 = vadd.f32 %v1081_v61, %v971_v9  ;;  %v985_v54 = vadd.f32 %v984_v60, %v852_v40 }
 0x1f6   :  { %v1087_v62 = vpop.f32.mrf.mxu0  ;;  %v1177_v58 = vpop.f32.mrf.mxu1 }
 0x1f7   :  { %v1088_v45 = vadd.f32 %v1087_v62, %v976_v30  ;;  %v1178_v61 = vadd.f32 %v1177_v58, %v1072_v41 }
 0x1f8   :  { %v1089_v63 = vpop.f32.mrf.mxu0  ;;  %v1179_v0 = vpop.f32.mrf.mxu1 }
 0x1f9   :  { %v1180_v32 = vadd.f32 %v1179_v0, %v1074_v23  ;;  %v1090_v49 = vadd.f32 %v1089_v63, %v978_v42 }
 0x1fa   :  { %v1095_v8 = vpop.f32.mrf.mxu0 }
 0x1fb   :  { %v1186_v2 = vpop.f32.mrf.mxu1  ;;  %v1096_v0 = vadd.f32 %v1095_v8, %v983_v43 }
 0x1fc   :  { %v1097_v13 = vpop.f32.mrf.mxu0  ;;  %v1187_v38 = vadd.f32 %v1186_v2, %v1080_v36 }
 0x1fd   :  { %v1188_v7 = vpop.f32.mrf.mxu1 }
 0x1fe   :  { %v1300_v14 = vpop.f32.mrf.mxu0  ;;  %v1189_v46 = vadd.f32 %v1188_v7, %v1082_v31  ;;  %v1098_v7 = vadd.f32 %v1097_v13, %v985_v54 }
 0x1ff   :  { %v1195_v16 = vpop.f32.mrf.mxu1 }
 0x200   :  { %v1302_v17 = vpop.f32.mrf.mxu0  ;;  %v1196_v51 = vadd.f32 %v1195_v16, %v1088_v45 }
 0x201   :  { %v1197_v1 = vpop.f32.mrf.mxu1  ;;  %v1303_v34 = vadd.f32 %v1302_v17, %v1180_v32  ;;  %v1301_v17 = vadd.f32 %v1300_v14, %v1178_v61 }
 0x202   :  { %v1307_v12 = vpop.f32.mrf.mxu0  ;;  %v1198_v10 = vadd.f32 %v1197_v1, %v1090_v49 }
 0x203   :  { %v1204_v4 = vpop.f32.mrf.mxu1  ;;  %v1308_v44 = vadd.f32 %v1307_v12, %v1187_v38  ;;  %v1435_v12 = vld [vmem:[%s2577_s5] sm:$0xf]  ;;  %s2069_s5 = smov [#allocation2]  }
 0x204   :  { %v1309_v21 = vpop.f32.mrf.mxu0  ;;  %v1205_v57 = vadd.f32 %v1204_v4, %v1096_v0  ;;  %v1443_v4 = vsel %vm724_vm2, %v1435_v12, 0  ;;  %s1999_s9 = sshll.u32 %s2069_s5, 4  ;;  %s2000_s9 = int_to_ptr.vmem [resolvable:$true] %s1999_s9 }
 0x205   :  { %v1206_v6 = vpop.f32.mrf.mxu1  ;;  %v1310_v47 = vadd.f32 %v1309_v21, %v1189_v46  ;;  %v2467_v11 = vand.u32 4294901760, %v1443_v4  ;;  %s2045_s10 = scalar_lea.vmem %s2000_s9, 128  ;;  %p2050_p1 = scmp.lt.s32.totalorder %s2000_s9, %s2000_s9 }
 0x206   :  { %v1314_v27 = vpop.f32.mrf.mxu0  ;;  %v1207_v58 = vadd.f32 %v1206_v6, %v1098_v7  ;;  %p2046_p0 = scmp.ne.s32.totalorder %s2000_s9, %s2045_s10  ;;  %p2051_p2 = scmp.lt.s32.totalorder %s2045_s10, %s2045_s10 }
 0x207   :  { %v1401_v25 = vpop.f32.mrf.mxu1  ;;  %v1315_v55 = vadd.f32 %v1314_v27, %v1196_v51  ;;  %v2470_v6 = vsub.f32 %v1443_v4, %v2467_v11 }
 0x208   :  { %v1316_v37 = vpop.f32.mrf.mxu0  ;;  %v1402_v56 = vadd.f32 %v1401_v25, %v1301_v17  ;;  %p2052_p3 = por %p2051_p2, %p2050_p1 }
 0x209   :  { %v1403_v39 = vpop.f32.mrf.mxu1  ;;  %v1317_v2 = vadd.f32 %v1316_v37, %v1198_v10  ;;  %v1520_v30 = vand.u32 4294901760, %v2470_v6 }
 0x20a   :  { %v1404_v53 = vadd.f32 %v1403_v39, %v1303_v34  ;;  %v1321_v48 = vpop.f32.mrf.mxu0  ;;  %p2053_p4 = pnand %p2052_p3, %p2046_p0 }
 0x20b   :  { %v1408_v29 = vpop.f32.mrf.mxu1  ;;  %v1322_v20 = vadd.f32 %v1321_v48, %v1205_v57  ;;  %v1521_v46 = vsub.f32 %v2470_v6, %v1520_v30 }
 0x20c   :  { %v1409_v50 = vadd.f32 %v1408_v29, %v1308_v44  ;;  %2029 = vtanh.f32 %v1404_v53  ;;  %v1323_v16 = vpop.f32.mrf.mxu0 }
 0x20d   :  { %v1410_v59 = vpop.f32.mrf.mxu1  ;;  %v1324_v1 = vadd.f32 %v1323_v16, %v1207_v58  ;;  %v1522_v61 = vand.u32 4294901760, %v1521_v46 }
 0x20e   :  { %v1411_v62 = vadd.f32 %v1410_v59, %v1310_v47 }
 0x20f   :  { %v1415_v52 = vpop.f32.mrf.mxu1 }
 0x210   :  { %v1416_v63 = vadd.f32 %v1415_v52, %v1315_v55  ;;  %2031 = vtanh.f32 %v1411_v62 }
 0x211   :  { %v1417_v60 = vpop.f32.mrf.mxu1 }
 0x212   :  { %2033 = vtanh.f32 %v1416_v63  ;;  %v1418_v3 = vadd.f32 %v1417_v60, %v1317_v2 }
 0x213   :  { %2035 = vtanh.f32 %v1409_v50  ;;  %v1422_v8 = vpop.f32.mrf.mxu1 }
 0x214   :  { %2037 = vtanh.f32 %v1418_v3  ;;  %v1423_v13 = vadd.f32 %v1422_v8, %v1322_v20  ;;  %v1440_v8 = vpop.permute.xlu0 %1439 }
 0x215   :  { %2039 = vtanh.f32 %v1402_v56  ;;  %v1424_v14 = vpop.f32.mrf.mxu1 }
 0x216   :  { %2041 = vtanh.f32 %v1423_v13  ;;  %v1425_v15 = vadd.f32 %v1424_v14, %v1324_v1 }
 0x218   :  { %2043 = vtanh.f32 %v1425_v15 }
 0x219   :  { %v2030_v19 = vpop.eup %2029 }
 0x21a   :  { %v2483_v32 = vand.u32 4294901760, %v2030_v19 }
 0x21c   :  { %v2512_v38 = vsub.f32 %v2030_v19, %v2483_v32 }
 0x21d   :  { %v2032_v21 = vpop.eup %2031 }
 0x21e   :  { %v2476_v24 = vand.u32 4294901760, %v2032_v21  ;;  %v1591_v59 = vand.u32 4294901760, %v2512_v38 }
 0x21f   :  { %v2034_v26 = vpop.eup %2033 }
 0x220   :  { %v2036_v18 = vpop.eup %2035  ;;  %v2472_v23 = vand.u32 4294901760, %v2034_v26  ;;  %v2499_v45 = vsub.f32 %v2032_v21, %v2476_v24  ;;  %v1592_v52 = vsub.f32 %v2512_v38, %v1591_v59 }
 0x221   :  { %v2038_v9 = vpop.eup %2037  ;;  %v2478_v28 = vand.u32 4294901760, %v2036_v18 }
 0x222   :  { %v2040_v27 = vpop.eup %2039  ;;  %v2474_v22 = vand.u32 4294901760, %v2038_v9  ;;  %v2491_v37 = vsub.f32 %v2034_v26, %v2472_v23  ;;  %v1579_v47 = vand.u32 4294901760, %v2499_v45  ;;  %v1593_v16 = vand.u32 4294901760, %v1592_v52 }
 0x223   :  { %v2042_v25 = vpop.eup %2041  ;;  %v2488_v36 = vand.u32 4294901760, %v2040_v27  ;;  %v2505_v34 = vsub.f32 %v2036_v18, %v2478_v28 }
 0x224   :  { %v2481_v31 = vand.u32 4294901760, %v2042_v25  ;;  %v2486_v33 = vsub.f32 %v2038_v9, %v2474_v22  ;;  %v1573_v29 = vand.u32 4294901760, %v2491_v37  ;;  %v1580_v62 = vsub.f32 %v2499_v45, %v1579_v47 }
 0x225   :  { %v2044_v35 = vpop.eup %2043  ;;  %v2517_v49 = vsub.f32 %v2040_v27, %v2488_v36  ;;  %v1585_v54 = vand.u32 4294901760, %v2505_v34 }
 0x226   :  { %v2493_v39 = vand.u32 4294901760, %v2044_v35  ;;  %v2496_v42 = vsub.f32 %v2042_v25, %v2481_v31  ;;  %v1567_v43 = vand.u32 4294901760, %v2486_v33  ;;  %v1574_v0 = vsub.f32 %v2491_v37, %v1573_v29 }
 0x227   :  { %v1597_v10 = vand.u32 4294901760, %v2517_v49  ;;  %v1586_v17 = vsub.f32 %v2505_v34, %v1585_v54  ;;  %v1581_v63 = vand.u32 4294901760, %v1580_v62 }
 0x228   :  { %1470 = vmatprep.subr.mxu0 %v2493_v39  ;;  %v1554_v40 = vsub.f32 %v2044_v35, %v2493_v39  ;;  %v1561_v41 = vand.u32 4294901760, %v2496_v42  ;;  %v1568_v48 = vsub.f32 %v2486_v33, %v1567_v43  ;;  %v1575_v57 = vand.u32 4294901760, %v1574_v0 }
 0x229   :  { %1472 = vmatpush1.msra.mxu0 %v2481_v31  ;;  %v1598_v2 = vsub.f32 %v2517_v49, %v1597_v10  ;;  %v1587_v56 = vand.u32 4294901760, %v1586_v17 }
 0x22a   :  { %1474 = vmatprep.subr.mxu0 %v2474_v22  ;;  %v1555_v51 = vand.u32 4294901760, %v1554_v40  ;;  %v1562_v53 = vsub.f32 %v2496_v42, %v1561_v41  ;;  %v1569_v50 = vand.u32 4294901760, %v1568_v48 }
 0x22b   :  { %1476 = vmatpush1.msra.mxu0 %v2472_v23  ;;  %v1599_v60 = vand.u32 4294901760, %v1598_v2 }
 0x22c   :  { %1478 = vmatprep.subr.mxu0 %v2476_v24  ;;  %v1556_v44 = vsub.f32 %v1554_v40, %v1555_v51  ;;  %v1563_v7 = vand.u32 4294901760, %v1562_v53 }
 0x22d   :  { %1480 = vmatpush1.msra.mxu0 %v2478_v28 }
 0x22e   :  { %1482 = vmatprep.subr.mxu0 %v2483_v32  ;;  %v1557_v55 = vand.u32 4294901760, %v1556_v44 }
 0x22f   :  { %1484 = vmatpush1.msra.mxu0 %v2488_v36 }
 0x230   :  { %1523 = vmatmul.mubr.f32.vlgmr.msra.gmra.mxu0 %v1522_v61  ;;  %1558 = vmatprep.subr.mxu1 %v1557_v55 }
 0x231   :  { %1667 = vmatprep.subr.mxu0 %v1554_v40  ;;  %1564 = vmatpush1.msra.mxu1 %v1563_v7 }
 0x232   :  { %1670 = vmatpush1.msra.mxu0 %v2496_v42  ;;  %1570 = vmatprep.subr.mxu1 %v1569_v50 }
 0x233   :  { %1673 = vmatprep.subr.mxu0 %v2486_v33  ;;  %1576 = vmatpush1.msra.mxu1 %v1575_v57 }
 0x234   :  { %1676 = vmatpush1.msra.mxu0 %v2491_v37  ;;  %1582 = vmatprep.subr.mxu1 %v1581_v63 }
 0x235   :  { %1679 = vmatprep.subr.mxu0 %v2499_v45  ;;  %1588 = vmatpush1.msra.mxu1 %v1587_v56 }
 0x236   :  { %1682 = vmatpush1.msra.mxu0 %v2505_v34  ;;  %1594 = vmatprep.subr.mxu1 %v1593_v16 }
 0x237   :  { %1685 = vmatprep.subr.mxu0 %v2512_v38  ;;  %1600 = vmatpush1.msra.mxu1 %v1599_v60 }
 0x238   :  { %1688 = vmatpush1.msra.mxu0 %v2517_v49  ;;  %1635 = vmatmul.mubr.f32.vlgmr.msra.gmra.mxu1 %v2467_v11 }
 0x239   :  { %1721 = vmatprep.mubr.f32.mxu0 %v2067_v5  ;;  %1755 = vmatprep.subr.mxu1 %v2493_v39 }
 0x23a   :  { %1839 = vmatprep.subr.mxu0 %v1555_v51  ;;  %1724 = vmatmul.mubr.f32.vlgmr.msra.gmra.mxu0 %v2470_v6 }
 0x23b   :  { %1757 = vmatpush1.msra.mxu1 %v2481_v31  ;;  %1843 = vmatpush1.msra.mxu0 %v1561_v41 }
 0x23c   :  { %1759 = vmatprep.subr.mxu1 %v2474_v22  ;;  %1847 = vmatprep.subr.mxu0 %v1567_v43 }
 0x23d   :  { %1761 = vmatpush1.msra.mxu1 %v2472_v23  ;;  %1851 = vmatpush1.msra.mxu0 %v1573_v29 }
 0x23e   :  { %1763 = vmatprep.subr.mxu1 %v2476_v24  ;;  %1855 = vmatprep.subr.mxu0 %v1579_v47 }
 0x23f   :  { %1765 = vmatpush1.msra.mxu1 %v2478_v28  ;;  %1859 = vmatpush1.msra.mxu0 %v1585_v54 }
 0x240   :  { %1767 = vmatprep.subr.mxu1 %v2483_v32  ;;  %1863 = vmatprep.subr.mxu0 %v1591_v59 }
 0x241   :  { %1769 = vmatpush1.msra.mxu1 %v2488_v36  ;;  %1802 = vmatprep.mubr.f32.mxu1 %v2067_v5 }
 0x242   :  { %1867 = vmatpush1.msra.mxu0 %v1597_v10  ;;  %1806 = vmatmul.mubr.f32.vlgmr.msra.gmra.mxu1 %v1520_v30 }
 0x243   :  { %1933 = vmatprep.subr.mxu1 %v2493_v39  ;;  %1900 = vmatprep.mubr.f32.mxu0 %v2067_v5 }
 0x244   :  { %1935 = vmatpush1.msra.mxu1 %v2481_v31  ;;  %1902 = vmatmul.mubr.f32.vlgmr.msra.gmra.mxu0 %v2467_v11 }
 0x245   :  { %1937 = vmatprep.subr.mxu1 %v2474_v22  ;;  %1980 = vmatprep.mubr.f32.mxu1 %v2067_v5 }
 0x246   :  { %1939 = vmatpush1.msra.mxu1 %v2472_v23 }
 0x247   :  { %1941 = vmatprep.subr.mxu1 %v2476_v24 }
 0x248   :  { %1943 = vmatpush1.msra.mxu1 %v2478_v28 }
 0x249   :  { %1945 = vmatprep.subr.mxu1 %v2483_v32 }
 0x24a   :  { %1947 = vmatpush1.msra.mxu1 %v2488_v36 }
 0x24b   :  { %1982 = vmatmul.mubr.f32.vlgmr.msra.gmra.mxu1 %v2467_v11 }
 0x2f0   :  { %v1524_v58 = vpop.f32.mrf.mxu0 }
 0x2f1   :  { %v1525_v14 = vadd.f32 %v1524_v58, %v1440_v8 }
 0x2f2   :  { %v1526_v3 = vpop.f32.mrf.mxu0 }
 0x2f3   :  { %v1527_v5 = vadd.f32 %v1526_v3, %v1440_v8 }
 0x2f8   :  { %v1636_v20 = vpop.f32.mrf.mxu1 }
 0x2f9   :  { %v1637_v12 = vadd.f32 %v1636_v20, %v1525_v14 }
 0x2fa   :  { %v1638_v1 = vpop.f32.mrf.mxu1  ;;  %v1725_v13 = vpop.f32.mrf.mxu0 }
 0x2fb   :  { %v1639_v15 = vadd.f32 %v1638_v1, %v1527_v5  ;;  %v1726_v6 = vadd.f32 %v1725_v13, %v1637_v12 }
 0x2fc   :  { %v1727_v19 = vpop.f32.mrf.mxu0 }
 0x2fd   :  { %v1728_v18 = vadd.f32 %v1727_v19, %v1639_v15 }
 0x302   :  { %v1807_v4 = vpop.f32.mrf.mxu1 }
 0x303   :  { %v1808_v9 = vadd.f32 %v1807_v4, %v1726_v6 }
 0x304   :  { %v1809_v21 = vpop.f32.mrf.mxu1  ;;  %v1903_v26 = vpop.f32.mrf.mxu0 }
 0x305   :  { %v1810_v23 = vadd.f32 %v1809_v21, %v1728_v18  ;;  %v1904_v22 = vadd.f32 %v1903_v26, %v1808_v9 }
 0x306   :  { %v1905_v27 = vpop.f32.mrf.mxu0 }
 0x307   :  { %v1906_v24 = vadd.f32 %v1905_v27, %v1810_v23 }
 0x30b   :  { %v1983_v11 = vpop.f32.mrf.mxu1 }
 0x30c   :  { %v1984_v28 = vadd.f32 %v1983_v11, %v1904_v22 }
 0x30d   :  { %v1985_v25 = vpop.f32.mrf.mxu1 }
 0x30e   :  { %v1986_v30 = vadd.f32 %v1985_v25, %v1906_v24 }
 0x310   :  { %v1990_v31 = vcombine.low %v1984_v28, %v1986_v30 }
 0x312   :  { %1992 = vst [vmem:[#allocation2] sm:$0xff] %v1990_v31 }
 0x313   :  { %2056 = shalt.err (!%p2053_p4)
}
 0x314   :  { %2002 = dma.vmem_to_hbm [thread:$0]  %s2000_s9, 128, %s2579_s7, [#allocation3]  }
 0x315   :  { %2065 = dma.done.wait [#allocation3], 128  }
 0x316   :  { %2066 = vsyncadd [#allocation3], 4294967168 }
 0x317   :  { %2006 = vsyncpa [#allocation3], 1 }

</bundles_post_ra>
